<compile_context>
chip_gen: v7x
topology: tpu7x:2x2x1
jax: 0.10.0
libtpu: 0.0.40
codegen_flags: <defaults>
</compile_context>

<pallas_src>
import jax
import jax.numpy as jnp
from jax.experimental import pallas as pl
from jax.experimental.pallas import tpu as pltpu


def _round_up(x, m):
    return ((x + m - 1) // m) * m


# ----------------------------------------------------------------------------
# Pallas kernels: scores = q @ p_t    (q: [M, K] bf16, p_t: [K, N] bf16)
# ----------------------------------------------------------------------------
def _sim_kernel_single_k(q_ref, pt_ref, o_ref):
    # Whole K in one tile: one MXU matmul, direct lane-dense f32 store.
    o_ref[...] = jnp.dot(
        q_ref[...], pt_ref[...], preferred_element_type=jnp.float32
    ).astype(o_ref.dtype)


def _sim_kernel_multi_k(q_ref, pt_ref, o_ref, acc_ref):
    # grid = (m_tiles, n_tiles, k_tiles); reduction axis (k) is last.
    @pl.when(pl.program_id(2) == 0)
    def _():
        acc_ref[...] = jnp.zeros_like(acc_ref)

    acc_ref[...] += jnp.dot(
        q_ref[...], pt_ref[...], preferred_element_type=jnp.float32
    )

    @pl.when(pl.program_id(2) == pl.num_programs(2) - 1)
    def _():
        o_ref[...] = acc_ref[...].astype(o_ref.dtype)


def similarity_scores(q_emb, p_emb, *, tk_cap=2048):
    """scores[i, j] = <q_emb[i], p_emb[j]>.

    q_emb: [Nq, H], p_emb: [Np, H]  ->  scores [Nq, Np] (float32).

    Operands are cast to bf16 (f32 accumulation on the MXU).  p_emb is
    transposed ONCE here so the kernel RHS is already in (K, N) orientation.
    Ragged Nq / Np / H are zero-padded to tile multiples and sliced back.
    """
    Nq, H = q_emb.shape
    Np, Hp = p_emb.shape
    assert H == Hp, "hidden dims must match"
    assert tk_cap % 128 == 0 and tk_cap > 0

    # Tile selection: MXU-/lane-aligned, bounded so double-buffered bf16 tiles
    # (2*(tq*tk + tk*tp)*2B + out) stay well under 32 MiB scoped VMEM (v7x-safe).
    tq = 256 if Nq >= 256 else _round_up(Nq, 8)
    tp = 256 if Np >= 256 else _round_up(Np, 128)   # lane-dense output columns
    h_pad = _round_up(H, 128)
    if h_pad <= tk_cap:
        tk = h_pad                                   # single K step
    else:
        tk = tk_cap
        h_pad = _round_up(H, tk)

    m_pad = _round_up(Nq, tq)
    n_pad = _round_up(Np, tp)

    q = q_emb.astype(jnp.bfloat16)
    pt = p_emb.astype(jnp.bfloat16).T                # one-time (K, N) layout

    q = jnp.pad(q, ((0, m_pad - Nq), (0, h_pad - H)))
    pt = jnp.pad(pt, ((0, h_pad - H), (0, n_pad - Np)))

    n_k = h_pad // tk
    out_shape = jax.ShapeDtypeStruct((m_pad, n_pad), jnp.float32)

    if n_k == 1:
        scores = pl.pallas_call(
            _sim_kernel_single_k,
            out_shape=out_shape,
            grid_spec=pltpu.PrefetchScalarGridSpec(
                num_scalar_prefetch=0,
                grid=(m_pad // tq, n_pad // tp),
                in_specs=[
                    pl.BlockSpec((tq, tk), lambda i, j: (i, 0)),
                    pl.BlockSpec((tk, tp), lambda i, j: (0, j)),
                ],
                out_specs=pl.BlockSpec((tq, tp), lambda i, j: (i, j)),
            ),
            compiler_params=pltpu.CompilerParams(
                dimension_semantics=("parallel", "parallel"),
                vmem_limit_bytes=32 * 1024 * 1024,
            ),
        )(q, pt)
    else:
        scores = pl.pallas_call(
            _sim_kernel_multi_k,
            out_shape=out_shape,
            grid_spec=pltpu.PrefetchScalarGridSpec(
                num_scalar_prefetch=0,
                grid=(m_pad // tq, n_pad // tp, n_k),
                in_specs=[
                    pl.BlockSpec((tq, tk), lambda i, j, k: (i, k)),
                    pl.BlockSpec((tk, tp), lambda i, j, k: (k, j)),
                ],
                out_specs=pl.BlockSpec((tq, tp), lambda i, j, k: (i, j)),
                scratch_shapes=[pltpu.VMEM((tq, tp), jnp.float32)],
            ),
            compiler_params=pltpu.CompilerParams(
                dimension_semantics=("parallel", "parallel", "arbitrary"),
                vmem_limit_bytes=32 * 1024 * 1024,
            ),
        )(q, pt)

    return scores[:Nq, :Np]


# ----------------------------------------------------------------------------
# SetOps wrapper
# ----------------------------------------------------------------------------
class SetOps:
    """JAX/Pallas analogue of the PyTorch SetOps module.

    The dual-encoder projection weights are synthetic, deterministically
    initialized stand-ins for DualEncoder.build(None).
    """

    def __init__(self, hidden=128, key=jax.random.PRNGKey(0)):
        kq, kp = jax.random.split(key)
        self.wq = (jax.random.normal(kq, (hidden, hidden), jnp.float32)
                   / jnp.sqrt(hidden))
        self.wp = (jax.random.normal(kp, (hidden, hidden), jnp.float32)
                   / jnp.sqrt(hidden))

    def encode_and_score(self, q_feats, p_feats):
        """Representative DualEncoder hot path (Pallas similarity kernel)."""
        # Glue projections stay in plain JAX (see TODO(synk) on fusion above);
        # bf16 cast + (K, N) layout happen once inside similarity_scores.
        q_emb = q_feats @ self.wq
        p_emb = p_feats @ self.wp
        return similarity_scores(q_emb, p_emb)

    def forward(self):
        """Matches the reference forward(): no args, body is `pass`."""
        return None


if __name__ == "__main__":
    key = jax.random.PRNGKey(0)
    k1, k2, k3, k4, k5 = jax.random.split(key, 5)

    hidden = 128
    n_query, n_passage = 8, 8
    q_feats = jax.random.normal(k1, (n_query, hidden), jnp.float32)
    p_feats = jax.random.normal(k2, (n_passage, hidden), jnp.float32)

    model = SetOps(hidden=hidden, key=k3)

    # forward() semantics match the PyTorch module exactly (returns None).
    assert model.forward() is None

    def bf16_ref(a, b):
        a16 = a.astype(jnp.bfloat16).astype(jnp.float32)
        b16 = b.astype(jnp.bfloat16).astype(jnp.float32)
        return a16 @ b16.T

    # Main path: dual-encoder similarity kernel (single-K fast path).
    scores = model.encode_and_score(q_feats, p_feats)
    jax.block_until_ready(scores)

    q_emb = q_feats @ model.wq
    p_emb = p_feats @ model.wp
    assert scores.shape == (n_query, n_passage)
    assert jnp.allclose(scores, bf16_ref(q_emb, p_emb), atol=1e-2, rtol=1e-2)

    # Ragged shapes (exercises the zero-pad + slice remainder handling).
    a1 = jax.random.normal(k4, (20, 96), jnp.float32)
    b1 = jax.random.normal(k5, (36, 96), jnp.float32)
    s1 = similarity_scores(a1, b1)
    jax.block_until_ready(s1)
    assert s1.shape == (20, 36)
    assert jnp.allclose(s1, bf16_ref(a1, b1), atol=1e-2, rtol=1e-2)

    # Forced multi-K path (accumulator scratch + reduction grid axis).
    a2 = jax.random.normal(k4, (24, 256), jnp.float32)
    b2 = jax.random.normal(k5, (40, 256), jnp.float32)
    s2 = similarity_scores(a2, b2, tk_cap=128)   # 2 K-steps
    jax.block_until_ready(s2)
    assert s2.shape == (24, 40)
    assert jnp.allclose(s2, bf16_ref(a2, b2), atol=1e-2, rtol=1e-2)

    print("KERNEL_OK")
</pallas_src>

<mosaic_0001>
module attributes {stable_mosaic.version = 11 : i64} {
  func.func @_sim_kernel_single_k(%arg0: i32, %arg1: i32, %arg2: memref<8x128xbf16, #tpu.memory_space<vmem>>, %arg3: memref<128x128xbf16, #tpu.memory_space<vmem>>, %arg4: memref<8x128xf32, #tpu.memory_space<vmem>>) attributes {dimension_semantics = [#tpu.dimension_semantics<parallel>, #tpu.dimension_semantics<parallel>], iteration_bounds = array<i64: 1, 1>, scalar_prefetch = 0 : i64, scratch_operands = 0 : i64, tpu.core_type = #tpu.core_type<tc>, window_params = [{transform_indices = @transform_0, window_bounds = array<i64: 8, 128>}, {transform_indices = @transform_1, window_bounds = array<i64: 128, 128>}, {transform_indices = @transform_2, window_bounds = array<i64: 8, 128>}]} {
    %c0 = arith.constant 0 : index
    %c0_0 = arith.constant 0 : index
    %0 = vector.load %arg2[%c0, %c0_0] : memref<8x128xbf16, #tpu.memory_space<vmem>>, vector<8x128xbf16>
    %c0_1 = arith.constant 0 : index
    %c0_2 = arith.constant 0 : index
    %1 = vector.load %arg3[%c0_1, %c0_2] : memref<128x128xbf16, #tpu.memory_space<vmem>>, vector<128x128xbf16>
    %cst = arith.constant dense<0.000000e+00> : vector<8x128xf32>
    %2 = tpu.matmul %0, %1, %cst {dimension_numbers = #tpu.dot_dimension_numbers<[1], [0], [0], [1], [0, 0, 1, 1], [], []>} : vector<8x128xbf16>, vector<128x128xbf16>, vector<8x128xf32> -> vector<8x128xf32>
    %c0_3 = arith.constant 0 : index
    %c0_4 = arith.constant 0 : index
    %3 = vector.load %arg4[%c0_3, %c0_4] : memref<8x128xf32, #tpu.memory_space<vmem>>, vector<8x128xf32>
    tpu.vector_store %arg4[%c0_3, %c0_4], %2 {strides = array<i32>} : memref<8x128xf32, #tpu.memory_space<vmem>>, vector<8x128xf32>,
    return
  }
  func.func @transform_0(%arg0: i32, %arg1: i32) -> (i32, i32) {
    %c0_i32 = arith.constant 0 : i32
    %c0_i32_0 = arith.constant 0 : i32
    return %arg0, %c0_i32 : i32, i32
  }
  func.func @transform_1(%arg0: i32, %arg1: i32) -> (i32, i32) {
    %c0_i32 = arith.constant 0 : i32
    %c0_i32_0 = arith.constant 0 : i32
    return %c0_i32, %arg1 : i32, i32
  }
  func.func @transform_2(%arg0: i32, %arg1: i32) -> (i32, i32) {
    %c0_i32 = arith.constant 0 : i32
    return %arg0, %arg1 : i32, i32
  }
}

</mosaic_0001>

<bundles_post_ra>
// kernel: tpu_custom_call.1
= control target key start
LH: loop header
LB: loop body
LE: loop exit
PB: predicated region body
PF: predicated region fallthrough
CT: control target
= control target key end

     0   :  { %7 = vsyncpa [#allocation3], 0  ;;  %s350_s0 = inlined_call_operand.hbm [shape: bf16[8,128], index: 0, kind: input, shape index: {}]   ;;  %s351_s1 = inlined_call_operand.hbm [shape: bf16[128,128], index: 1, kind: input, shape index: {}]   ;;  %s352_s2 = inlined_call_operand.hbm [shape: f32[8,128], index: 2, kind: output, shape index: {}]  }
   0x1   :  { %8 = vsyncpa [#allocation6], 0 }
   0x2   :  { %9 = vsyncpa [#allocation4], 0  ;;  %s285_s9 = smov [#allocation2]   ;;  %s286_s11 = smov [#allocation5]  }
   0x3   :  { %s16_s10 = sshll.u32 %s285_s9, 4  ;;  %s25_s12 = sshll.u32 %s286_s11, 4  ;;  %s17_s10 = int_to_ptr.vmem [resolvable:$true] %s16_s10  ;;  %s307_s12 = int_to_ptr.vmem [resolvable:$true] %s25_s12 }
   0x4   :  { %s213_s15 = scalar_lea.hbm %s350_s0, 64 }
   0x5   :  { %p214_p0 = scmp.ne.s32.totalorder %s350_s0, %s213_s15  ;;  %p217_p1 = scmp.lt.u32.totalorder %s213_s15, %s350_s0 }
   0x7   :  { %p219_p2 = pnand %p217_p1, %p214_p0 }
   0x9   :  { %222 = shalt.err (!%p219_p2)
}
   0xa   :  { %s223_s20 = scalar_lea.vmem %s17_s10, 64  ;;  %p228_p4 = scmp.lt.s32.totalorder %s17_s10, %s17_s10 }
   0xb   :  { %p224_p3 = scmp.ne.s32.totalorder %s17_s10, %s223_s20  ;;  %p229_p5 = scmp.lt.s32.totalorder %s223_s20, %s223_s20 }
   0xd   :  { %p230_p6 = por %p229_p5, %p228_p4 }
   0xf   :  { %p231_p7 = pnand %p230_p6, %p224_p3 }
  0x11   :  { %234 = shalt.err (!%p231_p7)
}
  0x12   :  { %19 = dma.hbm_to_vmem [thread:$0]  %s350_s0, 64, %s17_s10, [#allocation3]  }
  0x13   :  { %s235_s25 = scalar_lea.hbm %s351_s1, 1024 }
  0x14   :  { %p236_p8 = scmp.ne.s32.totalorder %s351_s1, %s235_s25  ;;  %p239_p9 = scmp.lt.u32.totalorder %s235_s25, %s351_s1 }
  0x16   :  { %p241_p10 = pnand %p239_p9, %p236_p8 }
  0x18   :  { %244 = shalt.err (!%p241_p10)
}
  0x19   :  { %s245_s30 = scalar_lea.vmem %s307_s12, 1024  ;;  %p250_p12 = scmp.lt.s32.totalorder %s307_s12, %s307_s12 }
  0x1a   :  { %p246_p11 = scmp.ne.s32.totalorder %s307_s12, %s245_s30  ;;  %p251_p13 = scmp.lt.s32.totalorder %s245_s30, %s245_s30 }
  0x1c   :  { %p252_p0 = por %p251_p13, %p250_p12 }
  0x1e   :  { %p253_p1 = pnand %p252_p0, %p246_p11 }
  0x20   :  { %256 = shalt.err (!%p253_p1)
}
  0x21   :  { %s287_s0 = smov 64   ;;  %s288_s3 = smov 4  }
  0x22   :  { %31 = dma.hbm_to_vmem [thread:$0]  %s351_s1, 1024, %s307_s12, [#allocation6], %s287_s0, %s287_s0, %s288_s3  }
  0x23   :  { %279 = dma.done.wait [#allocation3], 64  }
  0x24   :  { %280 = vsyncadd [#allocation3], 4294967232 }
  0x25   :  { %281 = dma.done.wait [#allocation6], 1024  }
  0x26   :  { %282 = vsyncadd [#allocation6], 4294966272  ;;  %v289_v0 = vmov 0.0   ;;  %vm290_vm0 = vmmov 0   ;;  %v205_v1 = vld [vmem:[#allocation5] sm:$0xff]   ;;  %v206_v2 = vld [vmem:[#allocation5 + $0x8] sm:$0xff]  }
  0x27   :  { %178 = vmatprep.subr.bf16.mxu0 %v289_v0  ;;  %194 = vmatprep.mubr.msk.bf16.mxu0 %vm290_vm0, %v289_v0  ;;  %v207_v3 = vld [vmem:[#allocation5 + $0x10] sm:$0xff]   ;;  %v208_v4 = vld [vmem:[#allocation5 + $0x18] sm:$0xff]   ;;  %v209_v5 = vld [vmem:[#allocation5 + $0x20] sm:$0xff]   ;;  %s291_s1 = smov [#allocation7]  }
  0x28   :  { %179 = vmatpush3.bf16.msra.mxu0 %v205_v1  ;;  %v210_v6 = vld [vmem:[#allocation5 + $0x28] sm:$0xff]   ;;  %v211_v7 = vld [vmem:[#allocation5 + $0x30] sm:$0xff]   ;;  %v212_v8 = vld [vmem:[#allocation5 + $0x38] sm:$0xff]   ;;  %s151_s6 = sshll.u32 %s291_s1, 4  ;;  %s152_s6 = int_to_ptr.vmem [resolvable:$true] %s151_s6 }
  0x29   :  { %180 = vmatprep.subr.bf16.mxu0 %v289_v0  ;;  %v39_v9 = vld [vmem:[#allocation2] sm:$0xf]  ;;  %s257_s7 = scalar_lea.vmem %s152_s6, 128  ;;  %p262_p3 = scmp.lt.s32.totalorder %s152_s6, %s152_s6 }
  0x2a   :  { %p258_p2 = scmp.ne.s32.totalorder %s152_s6, %s257_s7  ;;  %p263_p4 = scmp.lt.s32.totalorder %s257_s7, %s257_s7 }
  0x2c   :  { %181 = vmatpush3.bf16.msra.mxu0 %v206_v2  ;;  %p264_p5 = por %p263_p4, %p262_p3 }
  0x2d   :  { %182 = vmatprep.subr.bf16.mxu0 %v289_v0 }
  0x2e   :  { %p265_p6 = pnand %p264_p5, %p258_p2 }
  0x30   :  { %183 = vmatpush3.bf16.msra.mxu0 %v207_v3 }
  0x31   :  { %184 = vmatprep.subr.bf16.mxu0 %v289_v0 }
  0x34   :  { %185 = vmatpush3.bf16.msra.mxu0 %v208_v4 }
  0x35   :  { %186 = vmatprep.subr.bf16.mxu0 %v289_v0 }
  0x38   :  { %187 = vmatpush3.bf16.msra.mxu0 %v209_v5 }
  0x39   :  { %188 = vmatprep.subr.bf16.mxu0 %v289_v0 }
  0x3c   :  { %189 = vmatpush3.bf16.msra.mxu0 %v210_v6 }
  0x3d   :  { %190 = vmatprep.subr.bf16.mxu0 %v289_v0 }
  0x40   :  { %191 = vmatpush3.bf16.msra.mxu0 %v211_v7 }
  0x41   :  { %192 = vmatprep.subr.bf16.mxu0 %v289_v0 }
  0x44   :  { %193 = vmatpush3.bf16.msra.mxu0 %v212_v8 }
  0x47   :  { %195 = vmatmul.mubr.bf16.vlgmr.msra.gmra.mrb[0].mxu0 %v39_v9 }
 0x11a   :  { %v138_v10 = vpop.f32.mrb[0].mxu0 }
 0x11b   :  { %144 = vst [vmem:[#allocation7] sm:$0xff] %v138_v10  ;;  %v196_v11 = vpop.f32.mrb[1].mxu0 }
 0x11c   :  { %v141_v12 = vpop.f32.mrb[2].mxu0 }
 0x11d   :  { %268 = shalt.err (!%p265_p6)
}
 0x11e   :  { %s269_s10 = scalar_lea.hbm %s352_s2, 128 }
 0x11f   :  { %p270_p7 = scmp.ne.s32.totalorder %s352_s2, %s269_s10  ;;  %p273_p8 = scmp.lt.u32.totalorder %s269_s10, %s352_s2 }
 0x121   :  { %p275_p9 = pnand %p273_p8, %p270_p7 }
 0x123   :  { %278 = shalt.err (!%p275_p9)
}
 0x124   :  { %154 = dma.vmem_to_hbm [thread:$0]  %s152_s6, 128, %s352_s2, [#allocation4]   ;;  %v197_v13 = vpop.f32.mrb[3].mxu0 }
 0x125   :  { %283 = dma.done.wait [#allocation4], 128  }
 0x126   :  { %284 = vsyncadd [#allocation4], 4294967168 }
 0x127   :  { %158 = vsyncpa [#allocation3], 1 }
 0x128   :  { %159 = vsyncpa [#allocation6], 1 }
 0x129   :  { %160 = vsyncpa [#allocation4], 1 }

</bundles_post_ra>
